<compile_context>
chip_gen: v6e
topology: v6e:2x2x1
jax: 0.10.0
libtpu: 0.0.40
codegen_flags: <defaults>
</compile_context>

<pallas_src>
import functools

import jax
import jax.numpy as jnp
from jax import lax
from jax.experimental import pallas as pl
from jax.experimental.pallas import tpu as pltpu

EPS = 1e-5
LANE = 128


def _round_up(x, m):
    return ((x + m - 1) // m) * m


def _vmem_limit_bytes():
    """Per-generation scoped-VMEM limit (~3/4 of physical, capped at 112 MiB)."""
    try:
        cap = pltpu.get_tpu_info().vmem_capacity_bytes
    except Exception:
        cap = 128 * 1024 * 1024
    return min(int(cap * 3 // 4), 112 * 1024 * 1024)


def _row_masks(L, dtype):
    """(L, 1) masks that zero the wrapped boundary row of each rolled neighbor copy."""
    row = lax.broadcasted_iota(jnp.int32, (L, 1), 0)
    mask_prev = (row > 0).astype(dtype)        # x_prev[0] must be 0
    mask_next = (row < L - 1).astype(dtype)    # x_next[L-1] must be 0
    return mask_prev, mask_next


def _conv3_fused(x, w_ref):
    """k=3 pad=1 conv of x:(L, Cin_p) against w_ref:(3*Cin_p, Cout_p).
    Single MXU matmul with K = 3*Cin_p; f32 accumulation. Returns (L, Cout_p) f32."""
    L = x.shape[0]
    mask_prev, mask_next = _row_masks(L, x.dtype)
    x_prev = pltpu.roll(x, 1, 0) * mask_prev          # x_prev[l] = x[l-1], 0 at l=0
    x_next = pltpu.roll(x, L - 1, 0) * mask_next      # x_next[l] = x[l+1], 0 at l=L-1
    x_cat = jnp.concatenate([x_prev, x, x_next], axis=-1)   # (L, 3*Cin_p)
    return jnp.dot(x_cat, w_ref[...], preferred_element_type=jnp.float32)


def _partial_stats(y):
    s = jnp.sum(y, axis=0, keepdims=True)
    ss = jnp.sum(y * y, axis=0, keepdims=True)
    return jnp.concatenate([s, ss], axis=0)          # (2, C) f32


def _conv1_stats_kernel(x_ref, w_ref, y_ref, st_ref):
    y = _conv3_fused(x_ref[0], w_ref)                # (L, Cmid_p) f32
    st_ref[0] = _partial_stats(y)
    y_ref[0] = y.astype(y_ref.dtype)


def _bn_relu_conv2_stats_kernel(y1_ref, sc_ref, bi_ref, w_ref, y2_ref, st_ref):
    h = jnp.maximum(y1_ref[0].astype(jnp.float32) * sc_ref[...] + bi_ref[...], 0.0)
    y = _conv3_fused(h.astype(w_ref.dtype), w_ref)   # (L, Cout_p) f32
    st_ref[0] = _partial_stats(y)
    y2_ref[0] = y.astype(y2_ref.dtype)


def _bn_relu_out_kernel(y_ref, sc_ref, bi_ref, o_ref):
    o = jnp.maximum(y_ref[0].astype(jnp.float32) * sc_ref[...] + bi_ref[...], 0.0)
    # Slice the padded channels and transpose NLC -> NCL in-kernel so the wrapper does no
    # extra HBM slice/transpose passes.
    o_ref[0] = jnp.transpose(o)[: o_ref.shape[1], :].astype(o_ref.dtype)


def _fold_bn(stats, gamma_p, beta_p, count):
    """stats: (N, 2, C) partial [sum, sumsq] -> folded (scale, bias) of shape (1, C)."""
    s = jnp.sum(stats[:, 0, :], axis=0)
    ss = jnp.sum(stats[:, 1, :], axis=0)
    mean = s / count
    var = jnp.maximum(ss / count - mean * mean, 0.0)
    scale = gamma_p * lax.rsqrt(var + EPS)
    bias = beta_p - mean * scale
    return scale[None, :].astype(jnp.float32), bias[None, :].astype(jnp.float32)


@functools.partial(jax.jit, static_argnames=("compute_dtype", "intermediate_dtype"))
def double_conv(x_ncl, w1, g1, b1, w2, g2, b2, *,
                compute_dtype=jnp.float32, intermediate_dtype=None):
    """x_ncl: (N, Cin, L) f32 (PyTorch Conv1d layout). Returns (N, Cout, L) f32.

    compute_dtype: MXU input dtype (bf16 on v6e/v7x for throughput; f32 for exactness).
    intermediate_dtype: HBM dtype for y1/y2 (default = compute_dtype); bf16 halves the
    memory-bound traffic; BN stats are captured in f32 before the downcast.
    """
    N, Cin, L = x_ncl.shape
    Cmid, Cout = w1.shape[2], w2.shape[2]
    Cin_p, Cmid_p, Cout_p = (_round_up(c, LANE) for c in (Cin, Cmid, Cout))
    int_dtype = compute_dtype if intermediate_dtype is None else intermediate_dtype
    cbytes = jnp.dtype(compute_dtype).itemsize
    ibytes = jnp.dtype(int_dtype).itemsize

    # channels-last + zero-pad channel axes to lane-dense multiples of 128.
    # TODO(synk): keep activations channels-last across the surrounding model so the
    # input NCL->NLC transpose disappears too.
    x = jnp.transpose(x_ncl, (0, 2, 1)).astype(compute_dtype)
    x = jnp.pad(x, ((0, 0), (0, 0), (0, Cin_p - Cin)))
    # Flatten taps: rows [w[0]; w[1]; w[2]] to match x_cat = [x_prev | x | x_next].
    w1p = jnp.pad(w1, ((0, 0), (0, Cin_p - Cin), (0, Cmid_p - Cmid))
                  ).astype(compute_dtype).reshape(3 * Cin_p, Cmid_p)
    w2p = jnp.pad(w2, ((0, 0), (0, Cmid_p - Cmid), (0, Cout_p - Cout))
                  ).astype(compute_dtype).reshape(3 * Cmid_p, Cout_p)
    g1p = jnp.pad(g1.reshape(-1), (0, Cmid_p - Cmid)).astype(jnp.float32)
    b1p = jnp.pad(b1.reshape(-1), (0, Cmid_p - Cmid)).astype(jnp.float32)
    g2p = jnp.pad(g2.reshape(-1), (0, Cout_p - Cout)).astype(jnp.float32)
    b2p = jnp.pad(b2.reshape(-1), (0, Cout_p - Cout)).astype(jnp.float32)

    vmem_limit = _vmem_limit_bytes()
    # Largest pass (pass 2): double-buffered activation blocks + double-buffered weights.
    need = (2 * L * Cmid_p * ibytes + 2 * L * Cout_p * ibytes
            + 2 * 3 * Cmid_p * Cout_p * cbytes + 8 * (Cmid_p + Cout_p) * 4)
    if need > vmem_limit:
        # TODO(synk): add L-tiling (grid=(N, L//TL)) with manual halo DMA for this regime.
        raise ValueError(f"DoubleConv full-L blocks need ~{need} B VMEM "
                         f"(> limit {vmem_limit} B); add L-tiling or reduce L.")

    cparams = pltpu.CompilerParams(
        dimension_semantics=("parallel",),          # batch axis -> megacore sharding
        vmem_limit_bytes=vmem_limit)

    blk_act = lambda C: pl.BlockSpec((1, L, C), lambda n: (n, 0, 0))
    blk_w = lambda K, Co: pl.BlockSpec((K, Co), lambda n: (0, 0))
    blk_vec = lambda C: pl.BlockSpec((1, C), lambda n: (0, 0))
    blk_st = lambda C: pl.BlockSpec((1, 2, C), lambda n: (n, 0, 0))

    # ---- pass 1: conv1 (one K=3*Cin_p matmul) + per-sample BN1 partial stats ----
    ce1 = pl.CostEstimate(
        flops=2 * N * L * (3 * Cin_p) * Cmid_p, transcendentals=0,
        bytes_accessed=N * L * Cin_p * cbytes + 3 * Cin_p * Cmid_p * cbytes
                       + N * L * Cmid_p * ibytes + N * 2 * Cmid_p * 4)
    y1, st1 = pl.pallas_call(
        _conv1_stats_kernel,
        out_shape=(jax.ShapeDtypeStruct((N, L, Cmid_p), int_dtype),
                   jax.ShapeDtypeStruct((N, 2, Cmid_p), jnp.float32)),
        grid=(N,),
        in_specs=[blk_act(Cin_p), blk_w(3 * Cin_p, Cmid_p)],
        out_specs=(blk_act(Cmid_p), blk_st(Cmid_p)),
        compiler_params=cparams,
        cost_estimate=ce1,
    )(x, w1p)
    sc1, bi1 = _fold_bn(st1, g1p, b1p, float(N * L))

    # ---- pass 2: BN1+ReLU (folded affine) + conv2 + per-sample BN2 partial stats ----
    ce2 = pl.CostEstimate(
        flops=2 * N * L * (3 * Cmid_p) * Cout_p + 3 * N * L * Cmid_p, transcendentals=0,
        bytes_accessed=N * L * Cmid_p * ibytes + 3 * Cmid_p * Cout_p * cbytes
                       + N * L * Cout_p * ibytes + N * 2 * Cout_p * 4
                       + 8 * Cmid_p)
    y2, st2 = pl.pallas_call(
        _bn_relu_conv2_stats_kernel,
        out_shape=(jax.ShapeDtypeStruct((N, L, Cout_p), int_dtype),
                   jax.ShapeDtypeStruct((N, 2, Cout_p), jnp.float32)),
        grid=(N,),
        in_specs=[blk_act(Cmid_p), blk_vec(Cmid_p), blk_vec(Cmid_p),
                  blk_w(3 * Cmid_p, Cout_p)],
        out_specs=(blk_act(Cout_p), blk_st(Cout_p)),
        compiler_params=cparams,
        cost_estimate=ce2,
    )(y1, sc1, bi1, w2p)
    sc2, bi2 = _fold_bn(st2, g2p, b2p, float(N * L))

    # ---- pass 3: BN2 + ReLU, unpadded channel slice + NLC->NCL transpose in-kernel ----
    ce3 = pl.CostEstimate(
        flops=3 * N * L * Cout_p, transcendentals=0,
        bytes_accessed=N * L * Cout_p * ibytes + N * L * Cout * 4 + 8 * Cout_p)
    out_ncl = pl.pallas_call(
        _bn_relu_out_kernel,
        out_shape=jax.ShapeDtypeStruct((N, Cout, L), jnp.float32),
        grid=(N,),
        in_specs=[blk_act(Cout_p), blk_vec(Cout_p), blk_vec(Cout_p)],
        out_specs=pl.BlockSpec((1, Cout, L), lambda n: (n, 0, 0)),
        compiler_params=cparams,
        cost_estimate=ce3,
    )(y2, sc2, bi2)

    return out_ncl


def double_conv_ref(x_ncl, w1, g1, b1, w2, g2, b2):
    """Pure-JAX reference (same NLC math) for correctness checking."""
    x = jnp.transpose(x_ncl, (0, 2, 1))

    def block(h, w, g, b):
        hp = jnp.pad(h, ((0, 0), (1, 1), (0, 0)))
        L = h.shape[1]
        y = sum(jnp.einsum('nlc,cd->nld', hp[:, d:d + L, :], w[d]) for d in range(3))
        m = jnp.mean(y, axis=(0, 1), keepdims=True)
        v = jnp.mean((y - m) ** 2, axis=(0, 1), keepdims=True)
        y = (y - m) * lax.rsqrt(v + EPS) * g.reshape(1, 1, -1) + b.reshape(1, 1, -1)
        return jnp.maximum(y, 0.0)

    h = block(x, w1, g1, b1)
    o = block(h, w2, g2, b2)
    return jnp.transpose(o, (0, 2, 1))


if __name__ == "__main__":
    N, Cin, Cout, L = 2, 4, 8, 16
    Cmid = Cout  # mid_channels defaults to out_channels

    key = jax.random.PRNGKey(0)
    kx, k1, k2, kg1, kb1, kg2, kb2 = jax.random.split(key, 7)

    x = jax.random.normal(kx, (N, Cin, L), dtype=jnp.float32)
    w1 = jax.random.normal(k1, (3, Cin, Cmid), dtype=jnp.float32) * 0.2
    w2 = jax.random.normal(k2, (3, Cmid, Cout), dtype=jnp.float32) * 0.2
    g1 = 1.0 + 0.1 * jax.random.normal(kg1, (1, Cmid), dtype=jnp.float32)
    b1 = 0.1 * jax.random.normal(kb1, (1, Cmid), dtype=jnp.float32)
    g2 = 1.0 + 0.1 * jax.random.normal(kg2, (1, Cout), dtype=jnp.float32)
    b2 = 0.1 * jax.random.normal(kb2, (1, Cout), dtype=jnp.float32)

    ref = double_conv_ref(x, w1, g1, b1, w2, g2, b2)

    # f32 path (exact semantics; v5e-friendly vector path)
    out = double_conv(x, w1, g1, b1, w2, g2, b2)
    out = jax.block_until_ready(out)
    assert out.shape == (N, Cout, L)
    assert jnp.allclose(out, ref, atol=1e-3, rtol=1e-3), "f32 mismatch vs reference"

    # f32 compute with bf16 intermediates (memory-bound v5e option); stats stay f32.
    out_i16 = double_conv(x, w1, g1, b1, w2, g2, b2, intermediate_dtype=jnp.bfloat16)
    out_i16 = jax.block_until_ready(out_i16)
    assert jnp.allclose(out_i16, ref, atol=5e-2, rtol=5e-2), "bf16-intermediate mismatch"

    # bf16 MXU inputs + bf16 intermediates (v6e/v7x fast path); BN/stats stay f32.
    out_bf16 = double_conv(x, w1, g1, b1, w2, g2, b2, compute_dtype=jnp.bfloat16)
    out_bf16 = jax.block_until_ready(out_bf16)
    assert out_bf16.shape == (N, Cout, L)
    assert jnp.allclose(out_bf16, ref, atol=1e-1, rtol=1e-1), "bf16 mismatch vs reference"

    print("KERNEL_OK")
</pallas_src>

<mosaic_0001>
module attributes {stable_mosaic.version = 11 : i64} {
  func.func @_conv1_stats_kernel(%arg0: i32, %arg1: memref<1x16x128xf32, #tpu.memory_space<vmem>>, %arg2: memref<384x128xf32, #tpu.memory_space<vmem>>, %arg3: memref<1x16x128xf32, #tpu.memory_space<vmem>>, %arg4: memref<1x2x128xf32, #tpu.memory_space<vmem>>) attributes {dimension_semantics = [#tpu.dimension_semantics<parallel>], iteration_bounds = array<i64: 2>, scalar_prefetch = 0 : i64, scratch_operands = 0 : i64, tpu.core_type = #tpu.core_type<tc>, window_params = [{transform_indices = @transform_0, window_bounds = array<i64: 1, 16, 128>}, {pipeline_mode = #tpu.pipeline_mode<synchronous>, transform_indices = @transform_1, window_bounds = array<i64: 384, 128>}, {transform_indices = @transform_2, window_bounds = array<i64: 1, 16, 128>}, {transform_indices = @transform_3, window_bounds = array<i64: 1, 2, 128>}]} {
    %c0 = arith.constant 0 : index
    %c0_0 = arith.constant 0 : index
    %c0_1 = arith.constant 0 : index
    %0 = vector.load %arg1[%c0, %c0_0, %c0_1] : memref<1x16x128xf32, #tpu.memory_space<vmem>>, vector<1x16x128xf32>
    %1 = vector.shape_cast %0 : vector<1x16x128xf32> to vector<16x128xf32>
    %2 = tpu.iota {dimensions = array<i32: 0>} : vector<16x1xi32>
    %c0_i32 = arith.constant 0 : i32
    %3 = vector.broadcast %c0_i32 : i32 to vector<16x1xi32>
    %4 = arith.cmpi sgt, %2, %3 : vector<16x1xi32>
    %5 = arith.extui %4 : vector<16x1xi1> to vector<16x1xi32>
    %6 = arith.sitofp %5 : vector<16x1xi32> to vector<16x1xf32>
    %c15_i32 = arith.constant 15 : i32
    %7 = vector.broadcast %c15_i32 : i32 to vector<16x1xi32>
    %8 = arith.cmpi slt, %2, %7 : vector<16x1xi32>
    %9 = arith.extui %8 : vector<16x1xi1> to vector<16x1xi32>
    %10 = arith.sitofp %9 : vector<16x1xi32> to vector<16x1xf32>
    %c1_i32 = arith.constant 1 : i32
    %11 = tpu.dynamic_rotate %1 by %c1_i32 dim 0 : vector<16x128xf32>, i32 -> vector<16x128xf32>
    %12 = vector.broadcast %6 : vector<16x1xf32> to vector<16x128xf32>
    %13 = arith.mulf %11, %12 : vector<16x128xf32>
    %c15_i32_2 = arith.constant 15 : i32
    %14 = tpu.dynamic_rotate %1 by %c15_i32_2 dim 0 : vector<16x128xf32>, i32 -> vector<16x128xf32>
    %15 = vector.broadcast %10 : vector<16x1xf32> to vector<16x128xf32>
    %16 = arith.mulf %14, %15 : vector<16x128xf32>
    %17 = tpu.concatenate %13, %1, %16 in 1 : vector<16x128xf32>, vector<16x128xf32>, vector<16x128xf32> -> vector<16x384xf32>
    %c0_3 = arith.constant 0 : index
    %c0_4 = arith.constant 0 : index
    %18 = vector.load %arg2[%c0_3, %c0_4] : memref<384x128xf32, #tpu.memory_space<vmem>>, vector<384x128xf32>
    %cst = arith.constant dense<0.000000e+00> : vector<16x128xf32>
    %19 = tpu.matmul %17, %18, %cst {dimension_numbers = #tpu.dot_dimension_numbers<[1], [0], [0], [1], [0, 0, 1, 1], [], []>} : vector<16x384xf32>, vector<384x128xf32>, vector<16x128xf32> -> vector<16x128xf32>
    %cst_5 = arith.constant dense<0.000000e+00> : vector<128xf32>
    %20 = vector.multi_reduction <add>, %19, %cst_5 [0] : vector<16x128xf32> to vector<128xf32>
    %21 = vector.shape_cast %20 : vector<128xf32> to vector<1x128xf32>
    %22 = arith.mulf %19, %19 : vector<16x128xf32>
    %cst_6 = arith.constant dense<0.000000e+00> : vector<128xf32>
    %23 = vector.multi_reduction <add>, %22, %cst_6 [0] : vector<16x128xf32> to vector<128xf32>
    %24 = vector.shape_cast %23 : vector<128xf32> to vector<1x128xf32>
    %25 = tpu.concatenate %21, %24 in 0 : vector<1x128xf32>, vector<1x128xf32> -> vector<2x128xf32>
    %c0_7 = arith.constant 0 : index
    %c0_8 = arith.constant 0 : index
    %c0_9 = arith.constant 0 : index
    %26 = vector.load %arg4[%c0_7, %c0_8, %c0_9] : memref<1x2x128xf32, #tpu.memory_space<vmem>>, vector<1x2x128xf32>
    %27 = vector.shape_cast %26 : vector<1x2x128xf32> to vector<2x128xf32>
    %28 = vector.shape_cast %25 : vector<2x128xf32> to vector<1x2x128xf32>
    tpu.vector_store %arg4[%c0_7, %c0_8, %c0_9], %28 {strides = array<i32>} : memref<1x2x128xf32, #tpu.memory_space<vmem>>, vector<1x2x128xf32>,
    %c0_10 = arith.constant 0 : index
    %c0_11 = arith.constant 0 : index
    %c0_12 = arith.constant 0 : index
    %29 = vector.load %arg3[%c0_10, %c0_11, %c0_12] : memref<1x16x128xf32, #tpu.memory_space<vmem>>, vector<1x16x128xf32>
    %30 = vector.shape_cast %29 : vector<1x16x128xf32> to vector<16x128xf32>
    %31 = vector.shape_cast %19 : vector<16x128xf32> to vector<1x16x128xf32>
    tpu.vector_store %arg3[%c0_10, %c0_11, %c0_12], %31 {strides = array<i32>} : memref<1x16x128xf32, #tpu.memory_space<vmem>>, vector<1x16x128xf32>,
    return
  }
  func.func @transform_0(%arg0: i32) -> (i32, i32, i32) {
    %c0_i32 = arith.constant 0 : i32
    %c0_i32_0 = arith.constant 0 : i32
    %c0_i32_1 = arith.constant 0 : i32
    return %arg0, %c0_i32, %c0_i32_0 : i32, i32, i32
  }
  func.func @transform_1(%arg0: i32) -> (i32, i32) {
    %c0_i32 = arith.constant 0 : i32
    %c0_i32_0 = arith.constant 0 : i32
    %c0_i32_1 = arith.constant 0 : i32
    return %c0_i32, %c0_i32_0 : i32, i32
  }
  func.func @transform_2(%arg0: i32) -> (i32, i32, i32) {
    %c0_i32 = arith.constant 0 : i32
    %c0_i32_0 = arith.constant 0 : i32
    %c0_i32_1 = arith.constant 0 : i32
    return %arg0, %c0_i32, %c0_i32_0 : i32, i32, i32
  }
  func.func @transform_3(%arg0: i32) -> (i32, i32, i32) {
    %c0_i32 = arith.constant 0 : i32
    %c0_i32_0 = arith.constant 0 : i32
    %c0_i32_1 = arith.constant 0 : i32
    return %arg0, %c0_i32, %c0_i32_0 : i32, i32, i32
  }
}

module attributes {stable_mosaic.version = 11 : i64} {
  func.func @_bn_relu_conv2_stats_kernel(%arg0: i32, %arg1: memref<1x16x128xf32, #tpu.memory_space<vmem>>, %arg2: memref<1x128xf32, #tpu.memory_space<vmem>>, %arg3: memref<1x128xf32, #tpu.memory_space<vmem>>, %arg4: memref<384x128xf32, #tpu.memory_space<vmem>>, %arg5: memref<1x16x128xf32, #tpu.memory_space<vmem>>, %arg6: memref<1x2x128xf32, #tpu.memory_space<vmem>>) attributes {dimension_semantics = [#tpu.dimension_semantics<parallel>], iteration_bounds = array<i64: 2>, scalar_prefetch = 0 : i64, scratch_operands = 0 : i64, tpu.core_type = #tpu.core_type<tc>, window_params = [{transform_indices = @transform_0, window_bounds = array<i64: 1, 16, 128>}, {pipeline_mode = #tpu.pipeline_mode<synchronous>, transform_indices = @transform_1, window_bounds = array<i64: 1, 128>}, {pipeline_mode = #tpu.pipeline_mode<synchronous>, transform_indices = @transform_2, window_bounds = array<i64: 1, 128>}, {pipeline_mode = #tpu.pipeline_mode<synchronous>, transform_indices = @transform_3, window_bounds = array<i64: 384, 128>}, {transform_indices = @transform_4, window_bounds = array<i64: 1, 16, 128>}, {transform_indices = @transform_5, window_bounds = array<i64: 1, 2, 128>}]} {
    %c0 = arith.constant 0 : index
    %c0_0 = arith.constant 0 : index
    %c0_1 = arith.constant 0 : index
    %0 = vector.load %arg1[%c0, %c0_0, %c0_1] : memref<1x16x128xf32, #tpu.memory_space<vmem>>, vector<1x16x128xf32>
    %1 = vector.shape_cast %0 : vector<1x16x128xf32> to vector<16x128xf32>
    %c0_2 = arith.constant 0 : index
    %c0_3 = arith.constant 0 : index
    %2 = vector.load %arg2[%c0_2, %c0_3] : memref<1x128xf32, #tpu.memory_space<vmem>>, vector<1x128xf32>
    %3 = vector.broadcast %2 : vector<1x128xf32> to vector<16x128xf32>
    %4 = arith.mulf %1, %3 : vector<16x128xf32>
    %c0_4 = arith.constant 0 : index
    %c0_5 = arith.constant 0 : index
    %5 = vector.load %arg3[%c0_4, %c0_5] : memref<1x128xf32, #tpu.memory_space<vmem>>, vector<1x128xf32>
    %6 = vector.broadcast %5 : vector<1x128xf32> to vector<16x128xf32>
    %7 = arith.addf %4, %6 : vector<16x128xf32>
    %cst = arith.constant 0.000000e+00 : f32
    %8 = vector.broadcast %cst : f32 to vector<16x128xf32>
    %9 = arith.maximumf %7, %8 : vector<16x128xf32>
    %10 = tpu.iota {dimensions = array<i32: 0>} : vector<16x1xi32>
    %c0_i32 = arith.constant 0 : i32
    %11 = vector.broadcast %c0_i32 : i32 to vector<16x1xi32>
    %12 = arith.cmpi sgt, %10, %11 : vector<16x1xi32>
    %13 = arith.extui %12 : vector<16x1xi1> to vector<16x1xi32>
    %14 = arith.sitofp %13 : vector<16x1xi32> to vector<16x1xf32>
    %c15_i32 = arith.constant 15 : i32
    %15 = vector.broadcast %c15_i32 : i32 to vector<16x1xi32>
    %16 = arith.cmpi slt, %10, %15 : vector<16x1xi32>
    %17 = arith.extui %16 : vector<16x1xi1> to vector<16x1xi32>
    %18 = arith.sitofp %17 : vector<16x1xi32> to vector<16x1xf32>
    %c1_i32 = arith.constant 1 : i32
    %19 = tpu.dynamic_rotate %9 by %c1_i32 dim 0 : vector<16x128xf32>, i32 -> vector<16x128xf32>
    %20 = vector.broadcast %14 : vector<16x1xf32> to vector<16x128xf32>
    %21 = arith.mulf %19, %20 : vector<16x128xf32>
    %c15_i32_6 = arith.constant 15 : i32
    %22 = tpu.dynamic_rotate %9 by %c15_i32_6 dim 0 : vector<16x128xf32>, i32 -> vector<16x128xf32>
    %23 = vector.broadcast %18 : vector<16x1xf32> to vector<16x128xf32>
    %24 = arith.mulf %22, %23 : vector<16x128xf32>
    %25 = tpu.concatenate %21, %9, %24 in 1 : vector<16x128xf32>, vector<16x128xf32>, vector<16x128xf32> -> vector<16x384xf32>
    %c0_7 = arith.constant 0 : index
    %c0_8 = arith.constant 0 : index
    %26 = vector.load %arg4[%c0_7, %c0_8] : memref<384x128xf32, #tpu.memory_space<vmem>>, vector<384x128xf32>
    %cst_9 = arith.constant dense<0.000000e+00> : vector<16x128xf32>
    %27 = tpu.matmul %25, %26, %cst_9 {dimension_numbers = #tpu.dot_dimension_numbers<[1], [0], [0], [1], [0, 0, 1, 1], [], []>} : vector<16x384xf32>, vector<384x128xf32>, vector<16x128xf32> -> vector<16x128xf32>
    %cst_10 = arith.constant dense<0.000000e+00> : vector<128xf32>
    %28 = vector.multi_reduction <add>, %27, %cst_10 [0] : vector<16x128xf32> to vector<128xf32>
    %29 = vector.shape_cast %28 : vector<128xf32> to vector<1x128xf32>
    %30 = arith.mulf %27, %27 : vector<16x128xf32>
    %cst_11 = arith.constant dense<0.000000e+00> : vector<128xf32>
    %31 = vector.multi_reduction <add>, %30, %cst_11 [0] : vector<16x128xf32> to vector<128xf32>
    %32 = vector.shape_cast %31 : vector<128xf32> to vector<1x128xf32>
    %33 = tpu.concatenate %29, %32 in 0 : vector<1x128xf32>, vector<1x128xf32> -> vector<2x128xf32>
    %c0_12 = arith.constant 0 : index
    %c0_13 = arith.constant 0 : index
    %c0_14 = arith.constant 0 : index
    %34 = vector.load %arg6[%c0_12, %c0_13, %c0_14] : memref<1x2x128xf32, #tpu.memory_space<vmem>>, vector<1x2x128xf32>
    %35 = vector.shape_cast %34 : vector<1x2x128xf32> to vector<2x128xf32>
    %36 = vector.shape_cast %33 : vector<2x128xf32> to vector<1x2x128xf32>
    tpu.vector_store %arg6[%c0_12, %c0_13, %c0_14], %36 {strides = array<i32>} : memref<1x2x128xf32, #tpu.memory_space<vmem>>, vector<1x2x128xf32>,
    %c0_15 = arith.constant 0 : index
    %c0_16 = arith.constant 0 : index
    %c0_17 = arith.constant 0 : index
    %37 = vector.load %arg5[%c0_15, %c0_16, %c0_17] : memref<1x16x128xf32, #tpu.memory_space<vmem>>, vector<1x16x128xf32>
    %38 = vector.shape_cast %37 : vector<1x16x128xf32> to vector<16x128xf32>
    %39 = vector.shape_cast %27 : vector<16x128xf32> to vector<1x16x128xf32>
    tpu.vector_store %arg5[%c0_15, %c0_16, %c0_17], %39 {strides = array<i32>} : memref<1x16x128xf32, #tpu.memory_space<vmem>>, vector<1x16x128xf32>,
    return
  }
  func.func @transform_0(%arg0: i32) -> (i32, i32, i32) {
    %c0_i32 = arith.constant 0 : i32
    %c0_i32_0 = arith.constant 0 : i32
    %c0_i32_1 = arith.constant 0 : i32
    return %arg0, %c0_i32, %c0_i32_0 : i32, i32, i32
  }
  func.func @transform_1(%arg0: i32) -> (i32, i32) {
    %c0_i32 = arith.constant 0 : i32
    %c0_i32_0 = arith.constant 0 : i32
    %c0_i32_1 = arith.constant 0 : i32
    return %c0_i32, %c0_i32_0 : i32, i32
  }
  func.func @transform_2(%arg0: i32) -> (i32, i32) {
    %c0_i32 = arith.constant 0 : i32
    %c0_i32_0 = arith.constant 0 : i32
    %c0_i32_1 = arith.constant 0 : i32
    return %c0_i32, %c0_i32_0 : i32, i32
  }
  func.func @transform_3(%arg0: i32) -> (i32, i32) {
    %c0_i32 = arith.constant 0 : i32
    %c0_i32_0 = arith.constant 0 : i32
    %c0_i32_1 = arith.constant 0 : i32
    return %c0_i32, %c0_i32_0 : i32, i32
  }
  func.func @transform_4(%arg0: i32) -> (i32, i32, i32) {
    %c0_i32 = arith.constant 0 : i32
    %c0_i32_0 = arith.constant 0 : i32
    %c0_i32_1 = arith.constant 0 : i32
    return %arg0, %c0_i32, %c0_i32_0 : i32, i32, i32
  }
  func.func @transform_5(%arg0: i32) -> (i32, i32, i32) {
    %c0_i32 = arith.constant 0 : i32
    %c0_i32_0 = arith.constant 0 : i32
    %c0_i32_1 = arith.constant 0 : i32
    return %arg0, %c0_i32, %c0_i32_0 : i32, i32, i32
  }
}

module attributes {stable_mosaic.version = 11 : i64} {
  func.func @_bn_relu_out_kernel(%arg0: i32, %arg1: memref<1x16x128xf32, #tpu.memory_space<vmem>>, %arg2: memref<1x128xf32, #tpu.memory_space<vmem>>, %arg3: memref<1x128xf32, #tpu.memory_space<vmem>>, %arg4: memref<1x8x16xf32, #tpu.memory_space<vmem>>) attributes {dimension_semantics = [#tpu.dimension_semantics<parallel>], iteration_bounds = array<i64: 2>, scalar_prefetch = 0 : i64, scratch_operands = 0 : i64, tpu.core_type = #tpu.core_type<tc>, window_params = [{transform_indices = @transform_0, window_bounds = array<i64: 1, 16, 128>}, {pipeline_mode = #tpu.pipeline_mode<synchronous>, transform_indices = @transform_1, window_bounds = array<i64: 1, 128>}, {pipeline_mode = #tpu.pipeline_mode<synchronous>, transform_indices = @transform_2, window_bounds = array<i64: 1, 128>}, {transform_indices = @transform_3, window_bounds = array<i64: 1, 8, 16>}]} {
    %c0 = arith.constant 0 : index
    %c0_0 = arith.constant 0 : index
    %c0_1 = arith.constant 0 : index
    %0 = vector.load %arg1[%c0, %c0_0, %c0_1] : memref<1x16x128xf32, #tpu.memory_space<vmem>>, vector<1x16x128xf32>
    %1 = vector.shape_cast %0 : vector<1x16x128xf32> to vector<16x128xf32>
    %c0_2 = arith.constant 0 : index
    %c0_3 = arith.constant 0 : index
    %2 = vector.load %arg2[%c0_2, %c0_3] : memref<1x128xf32, #tpu.memory_space<vmem>>, vector<1x128xf32>
    %3 = vector.broadcast %2 : vector<1x128xf32> to vector<16x128xf32>
    %4 = arith.mulf %1, %3 : vector<16x128xf32>
    %c0_4 = arith.constant 0 : index
    %c0_5 = arith.constant 0 : index
    %5 = vector.load %arg3[%c0_4, %c0_5] : memref<1x128xf32, #tpu.memory_space<vmem>>, vector<1x128xf32>
    %6 = vector.broadcast %5 : vector<1x128xf32> to vector<16x128xf32>
    %7 = arith.addf %4, %6 : vector<16x128xf32>
    %cst = arith.constant 0.000000e+00 : f32
    %8 = vector.broadcast %cst : f32 to vector<16x128xf32>
    %9 = arith.maximumf %7, %8 : vector<16x128xf32>
    %10 = tpu.transpose %9, [1, 0] : vector<16x128xf32> -> vector<128x16xf32>
    %11 = vector.extract_strided_slice %10 {offsets = [0, 0], sizes = [8, 16], strides = [1, 1]} : vector<128x16xf32> to vector<8x16xf32>
    %c0_6 = arith.constant 0 : index
    %c0_7 = arith.constant 0 : index
    %c0_8 = arith.constant 0 : index
    %12 = vector.load %arg4[%c0_6, %c0_7, %c0_8] : memref<1x8x16xf32, #tpu.memory_space<vmem>>, vector<1x8x16xf32>
    %13 = vector.shape_cast %12 : vector<1x8x16xf32> to vector<8x16xf32>
    %14 = vector.shape_cast %11 : vector<8x16xf32> to vector<1x8x16xf32>
    tpu.vector_store %arg4[%c0_6, %c0_7, %c0_8], %14 {strides = array<i32>} : memref<1x8x16xf32, #tpu.memory_space<vmem>>, vector<1x8x16xf32>,
    return
  }
  func.func @transform_0(%arg0: i32) -> (i32, i32, i32) {
    %c0_i32 = arith.constant 0 : i32
    %c0_i32_0 = arith.constant 0 : i32
    %c0_i32_1 = arith.constant 0 : i32
    return %arg0, %c0_i32, %c0_i32_0 : i32, i32, i32
  }
  func.func @transform_1(%arg0: i32) -> (i32, i32) {
    %c0_i32 = arith.constant 0 : i32
    %c0_i32_0 = arith.constant 0 : i32
    %c0_i32_1 = arith.constant 0 : i32
    return %c0_i32, %c0_i32_0 : i32, i32
  }
  func.func @transform_2(%arg0: i32) -> (i32, i32) {
    %c0_i32 = arith.constant 0 : i32
    %c0_i32_0 = arith.constant 0 : i32
    %c0_i32_1 = arith.constant 0 : i32
    return %c0_i32, %c0_i32_0 : i32, i32
  }
  func.func @transform_3(%arg0: i32) -> (i32, i32, i32) {
    %c0_i32 = arith.constant 0 : i32
    %c0_i32_0 = arith.constant 0 : i32
    %c0_i32_1 = arith.constant 0 : i32
    return %arg0, %c0_i32, %c0_i32_0 : i32, i32, i32
  }
}

</mosaic_0001>

<bundles_post_ra>
// kernel: double_conv.3
= control target key start
LH: loop header
LB: loop body
LE: loop exit
PB: predicated region body
PF: predicated region fallthrough
CT: control target
= control target key end

     0   :  { %s663_s12 = smov 0   ;;  %s871_s0 = inlined_call_operand.vmem [shape: f32[2,16,128], index: 0, kind: input, shape index: {}]   ;;  %s872_s1 = inlined_call_operand.vmem [shape: f32[384,128], index: 1, kind: input, shape index: {}]   ;;  %s873_s2 = inlined_call_operand.vmem [shape: f32[2,16,128], index: 2, kind: output, shape index: {0}]   ;;  %s874_s3 = inlined_call_operand.vmem [shape: f32[2,2,128], index: 3, kind: output, shape index: {1}]  }
   0x1 LB: > { %s518_s13 = sadd.s32 4294967295, %s640_s12   ;;  %p522_p0 = scmp.ge.s32.totalorder %s640_s12, 1  ;;  %s640_s12 = sphi %s663_s12, %s14_s12  }
   0x2   : > { %p140_p1 = scmp.lt.s32.totalorder %s640_s12, 3 }
   0x4   : > { %p141_p2 = pnand %p522_p0, %p140_p1 }
   0x5   : > { %p709_p3 = scmp.lt.s32.totalorder (!%p141_p2), %s518_s13, 1 }
   0x6   : > { %144 = sbr.rel (%p141_p2) target bundleno = 265 (0x109), region = 28 }
   0xb   : > { %v244_v0 = vld [vmem:[%s872_s1 + $0xf8] sm:$0xff]  ;;  %v243_v2 = vld [vmem:[%s872_s1 + $0xf0] sm:$0xff]  ;;  %v242_v5 = vld [vmem:[%s872_s1 + $0xe8] sm:$0xff]  ;;  %s877_s13 = smov (!%p709_p3, %s518_s13), 1  ;;  %v184_v24 = vlaneseq  ;;  %v642_v52 = vmov 0.0   ;;  %vm427_vm4 = vcmask 1040384  }
   0xc   : > { %v228_v1 = vld [vmem:[%s872_s1 + $0x78] sm:$0xff]  ;;  %534 = vmatprep.subr.mxu0 %v244_v0  ;;  %v227_v4 = vld [vmem:[%s872_s1 + $0x70] sm:$0xff]  ;;  %v226_v7 = vld [vmem:[%s872_s1 + $0x68] sm:$0xff]  ;;  %s532_s11 = sshll.u32 %s877_s13, 4 }
   0xd   : > { %v260_v3 = vld [vmem:[%s872_s1 + $0x178] sm:$0xff]  ;;  %535 = vmatpush3.msra.mxu0 %v228_v1  ;;  %v259_v6 = vld [vmem:[%s872_s1 + $0x170] sm:$0xff]  ;;  %v258_v8 = vld [vmem:[%s872_s1 + $0x168] sm:$0xff]  ;;  %s172_s24 = scalar_lea.vmem %s871_s0, %s532_s11  ;;  %v779_v31 = vshrl.u32 %v184_v24, 7  ;;  %s177_s19 = scalar_lea.vmem %s873_s2, %s532_s11 }
   0xe   : > { %590 = vmatprep.subr.mxu1 %v260_v3  ;;  %536 = vmatprep.subr.mxu0 %v243_v2  ;;  %v241_v9 = vld [vmem:[%s872_s1 + $0xe0] sm:$0xff]  ;;  %v240_v12 = vld [vmem:[%s872_s1 + $0xd8] sm:$0xff]  ;;  %v239_v15 = vld [vmem:[%s872_s1 + $0xd0] sm:$0xff]  ;;  %s527_s11 = sshll.u32 %s877_s13, 1 }
   0xf   : > { %591 = vmatpush3.msra.mxu1 %v260_v3  ;;  %537 = vmatpush3.msra.mxu0 %v227_v4  ;;  %v225_v10 = vld [vmem:[%s872_s1 + $0x60] sm:$0xff]  ;;  %v224_v13 = vld [vmem:[%s872_s1 + $0x58] sm:$0xff]  ;;  %v223_v16 = vld [vmem:[%s872_s1 + $0x50] sm:$0xff]  ;;  %v186_v40 = vadd.s32 8, %v779_v31  ;;  %vm187_vm0 = vcmp.gt.s32.totalorder %v779_v31, 0  ;;  %vm201_vm1 = vcmp.lt.s32.totalorder %v779_v31, 1  ;;  %s181_s22 = scalar_lea.vmem %s874_s3, %s527_s11 }
  0x10   : > { %592 = vmatprep.subr.mxu1 %v259_v6  ;;  %538 = vmatprep.subr.mxu0 %v242_v5  ;;  %v257_v11 = vld [vmem:[%s872_s1 + $0x160] sm:$0xff]  ;;  %v256_v14 = vld [vmem:[%s872_s1 + $0x158] sm:$0xff]  ;;  %v255_v17 = vld [vmem:[%s872_s1 + $0x150] sm:$0xff]  ;;  %vm208_vm2 = vcmp.lt.s32.totalorder %v779_v31, 7  ;;  %v528_v53 = vsel %vm187_vm0, 1.0, %v642_v52 }
  0x11   : > { %593 = vmatpush3.msra.mxu1 %v259_v6  ;;  %539 = vmatpush3.msra.mxu0 %v226_v7  ;;  %v238_v18 = vld [vmem:[%s872_s1 + $0xc8] sm:$0xff]  ;;  %v237_v21 = vld [vmem:[%s872_s1 + $0xc0] sm:$0xff]  ;;  %v236_v25 = vld [vmem:[%s872_s1 + $0xb8] sm:$0xff]  ;;  %vm194_vm3 = vcmp.lt.s32.totalorder %v186_v40, 15 }
  0x12   : > { %594 = vmatprep.subr.mxu1 %v258_v8  ;;  %540 = vmatprep.subr.mxu0 %v241_v9  ;;  %v222_v19 = vld [vmem:[%s872_s1 + $0x48] sm:$0xff]  ;;  %v221_v22 = vld [vmem:[%s872_s1 + $0x40] sm:$0xff]  ;;  %v220_v26 = vld [vmem:[%s872_s1 + $0x38] sm:$0xff]  ;;  %v529_v59 = vsel %vm194_vm3, 1.0, %v642_v52 }
  0x13   : > { %595 = vmatpush3.msra.mxu1 %v258_v8  ;;  %541 = vmatpush3.msra.mxu0 %v225_v10  ;;  %v254_v20 = vld [vmem:[%s872_s1 + $0x148] sm:$0xff]  ;;  %v253_v23 = vld [vmem:[%s872_s1 + $0x140] sm:$0xff]  ;;  %v252_v27 = vld [vmem:[%s872_s1 + $0x138] sm:$0xff] }
  0x14   : > { %596 = vmatprep.subr.mxu1 %v257_v11  ;;  %542 = vmatprep.subr.mxu0 %v240_v12  ;;  %v235_v28 = vld [vmem:[%s872_s1 + $0xb0] sm:$0xff]  ;;  %v234_v32 = vld [vmem:[%s872_s1 + $0xa8] sm:$0xff]  ;;  %v790_v35 = vld [vmem:[%s172_s24] sm:$0xff] }
  0x15   : > { %597 = vmatpush3.msra.mxu1 %v257_v11  ;;  %543 = vmatpush3.msra.mxu0 %v224_v13  ;;  %v219_v29 = vld [vmem:[%s872_s1 + $0x30] sm:$0xff]  ;;  %v218_v33 = vld [vmem:[%s872_s1 + $0x28] sm:$0xff]  ;;  %v233_v37 = vld [vmem:[%s872_s1 + $0xa0] sm:$0xff]  ;;  %v199_v42 = vrot.slane %v790_v35, 7  ;;  %v206_v47 = vrot.slane %v790_v35, 1 }
  0x16   : > { %598 = vmatprep.subr.mxu1 %v256_v14  ;;  %544 = vmatprep.subr.mxu0 %v239_v15  ;;  %v251_v30 = vld [vmem:[%s872_s1 + $0x130] sm:$0xff]  ;;  %v250_v34 = vld [vmem:[%s872_s1 + $0x128] sm:$0xff]  ;;  %v217_v38 = vld [vmem:[%s872_s1 + $0x20] sm:$0xff] }
  0x17   : > { %599 = vmatpush3.msra.mxu1 %v256_v14  ;;  %545 = vmatpush3.msra.mxu0 %v223_v16  ;;  %v792_v36 = vld [vmem:[%s172_s24 + $0x8] sm:$0xff]  ;;  %v249_v39 = vld [vmem:[%s872_s1 + $0x120] sm:$0xff]  ;;  %v232_v41 = vld [vmem:[%s872_s1 + $0x98] sm:$0xff] }
  0x18   : > { %600 = vmatprep.subr.mxu1 %v255_v17  ;;  %546 = vmatprep.subr.mxu0 %v238_v18  ;;  %v200_v43 = vrot.slane %v792_v36, 7  ;;  %v216_v44 = vld [vmem:[%s872_s1 + $0x18] sm:$0xff]  ;;  %v231_v46 = vld [vmem:[%s872_s1 + $0x90] sm:$0xff]  ;;  %v207_v48 = vrot.slane %v792_v36, 1  ;;  %v230_v51 = vld [vmem:[%s872_s1 + $0x88] sm:$0xff] }
  0x19   : > { %601 = vmatpush3.msra.mxu1 %v255_v17  ;;  %547 = vmatpush3.msra.mxu0 %v222_v19  ;;  %v248_v45 = vld [vmem:[%s872_s1 + $0x118] sm:$0xff]  ;;  %v215_v49 = vld [vmem:[%s872_s1 + $0x10] sm:$0xff]  ;;  %v214_v55 = vld [vmem:[%s872_s1 + $0x8] sm:$0xff] }
  0x1a   : > { %602 = vmatprep.subr.mxu1 %v254_v20  ;;  %548 = vmatprep.subr.mxu0 %v237_v21  ;;  %v247_v50 = vld [vmem:[%s872_s1 + $0x110] sm:$0xff]  ;;  %v203_v54 = vsel %vm201_vm1, %v200_v43, %v199_v42  ;;  %v246_v56 = vld [vmem:[%s872_s1 + $0x108] sm:$0xff]  ;;  %v229_v57 = vld [vmem:[%s872_s1 + $0x80] sm:$0xff]  ;;  %v210_v58 = vsel %vm208_vm2, %v207_v48, %v206_v47  ;;  %v209_v63 = vsel %vm208_vm2, %v206_v47, %v207_v48 }
  0x1b   : > { %603 = vmatpush3.msra.mxu1 %v254_v20  ;;  %549 = vmatpush3.msra.mxu0 %v221_v22  ;;  %v213_v60 = vld [vmem:[%s872_s1] sm:$0xff]  ;;  %v204_v61 = vmul.f32 %v528_v53, %v203_v54  ;;  %v212_v0 = vmul.f32 %v529_v59, %v210_v58  ;;  %v202_v1 = vsel %vm201_vm1, %v199_v42, %v200_v43 }
  0x1c   : > { %604 = vmatprep.subr.mxu1 %v253_v23  ;;  %550 = vmatprep.subr.mxu0 %v236_v25  ;;  %v245_v62 = vld [vmem:[%s872_s1 + $0x100] sm:$0xff] }
  0x1d   : > { %605 = vmatpush3.msra.mxu1 %v253_v23  ;;  %551 = vmatpush3.msra.mxu0 %v220_v26 }
  0x1e   : > { %606 = vmatprep.subr.mxu1 %v252_v27  ;;  %552 = vmatprep.subr.mxu0 %v235_v28 }
  0x1f   : > { %607 = vmatpush3.msra.mxu1 %v252_v27  ;;  %553 = vmatpush3.msra.mxu0 %v219_v29 }
  0x20   : > { %608 = vmatprep.subr.mxu1 %v251_v30  ;;  %554 = vmatprep.subr.mxu0 %v234_v32 }
  0x21   : > { %609 = vmatpush3.msra.mxu1 %v251_v30  ;;  %555 = vmatpush3.msra.mxu0 %v218_v33 }
  0x22   : > { %610 = vmatprep.subr.mxu1 %v250_v34  ;;  %556 = vmatprep.subr.mxu0 %v233_v37 }
  0x23   : > { %611 = vmatpush3.msra.mxu1 %v250_v34  ;;  %557 = vmatpush3.msra.mxu0 %v217_v38 }
  0x24   : > { %612 = vmatprep.subr.mxu1 %v249_v39  ;;  %558 = vmatprep.subr.mxu0 %v232_v41 }
  0x25   : > { %613 = vmatpush3.msra.mxu1 %v249_v39  ;;  %559 = vmatpush3.msra.mxu0 %v216_v44 }
  0x26   : > { %614 = vmatprep.subr.mxu1 %v248_v45  ;;  %560 = vmatprep.subr.mxu0 %v231_v46 }
  0x27   : > { %615 = vmatpush3.msra.mxu1 %v248_v45  ;;  %561 = vmatpush3.msra.mxu0 %v215_v49 }
  0x28   : > { %616 = vmatprep.subr.mxu1 %v247_v50  ;;  %562 = vmatprep.subr.mxu0 %v230_v51 }
  0x29   : > { %617 = vmatpush3.msra.mxu1 %v247_v50  ;;  %563 = vmatpush3.msra.mxu0 %v214_v55 }
  0x2a   : > { %618 = vmatprep.subr.mxu1 %v246_v56  ;;  %564 = vmatprep.subr.mxu0 %v229_v57 }
  0x2b   : > { %325 = vmatprep.mubr.f32.mxu0 %v790_v35  ;;  %565 = vmatpush3.msra.mxu0 %v213_v60 }
  0x2c   : > { %619 = vmatpush3.msra.mxu1 %v246_v56  ;;  %326 = vmatmul.mubr.f32.vlgmr.msra.gmra.mxu0 %v204_v61 }
  0x2d   : > { %620 = vmatprep.subr.mxu1 %v245_v62  ;;  %622 = vmatprep.mubr.f32.mxu1 %v209_v63 }
  0x2e   : > { %621 = vmatpush3.msra.mxu1 %v245_v62  ;;  %330 = vmatprep.mubr.f32.mxu0 %v792_v36 }
  0x2f   : > { %623 = vmatmul.mubr.f32.vlgmr.msra.gmra.mxu1 %v212_v0 }
  0x30   : > { %331 = vmatmul.mubr.f32.gmra.mxu0 %v202_v1 }
  0xec   : > { %v566_v2 = vpop.f32.mrf.mxu0 }
  0xee   : > { %v567_v3 = vpop.f32.mrf.mxu0 }
  0xef   : > { %v624_v4 = vpop.f32.mrf.mxu1  ;;  %v568_v5 = vadd.f32 %v567_v3, %v566_v2 }
  0xf0   : > { %v569_v6 = vpop.f32.mrf.mxu0 }
  0xf1   : > { %v402_v7 = vpop.f32.mrf.mxu1 }
  0xf2   : > { %v403_v8 = vadd.f32 %v568_v5, %v402_v7  ;;  %v570_v9 = vpop.f32.mrf.mxu0 }
  0xf3   : > { %v571_v10 = vadd.f32 %v570_v9, %v569_v6 }
  0xf4   : > { %430 = vst [vmem:[%s177_s19] sm:$0xff] %v403_v8  ;;  %v418_v12 = vmul.f32 %v403_v8, %v403_v8 }
  0xf5   : > { %v408_v11 = vadd.f32 %v624_v4, %v571_v10 }
  0xf7   : > { %v411_v13 = vadd.f32 %v408_v11, %v403_v8  ;;  %v419_v14 = vmul.f32 %v408_v11, %v408_v11  ;;  %431 = vst [vmem:[%s177_s19 + $0x8] sm:$0xff] %v408_v11 }
  0xf9   : > { %v412_v15 = vrot.slane %v411_v13, 4  ;;  %v420_v16 = vadd.f32 %v419_v14, %v418_v12 }
  0xfb   : > { %v413_v17 = vadd.f32 %v412_v15, %v411_v13  ;;  %v421_v18 = vrot.slane %v420_v16, 4 }
  0xfd   : > { %v414_v19 = vrot.slane %v413_v17, 2  ;;  %v422_v20 = vadd.f32 %v421_v18, %v420_v16 }
  0xff   : > { %v415_v21 = vadd.f32 %v414_v19, %v413_v17  ;;  %v423_v22 = vrot.slane %v422_v20, 2 }
 0x101   : > { %v416_v23 = vrot.slane %v415_v21, 1  ;;  %v424_v24 = vadd.f32 %v423_v22, %v422_v20 }
 0x103   : > { %v425_v25 = vrot.slane %v424_v24, 1  ;;  %v417_v26 = vadd.f32 %v416_v23, %v415_v21 }
 0x105   : > { %v426_v27 = vadd.f32 %v425_v25, %v424_v24 }
 0x107   : > { %v428_v28 = vsel %vm427_vm4, %v417_v26, %v426_v27 }
 0x108   : > { %429 = vst [vmem:[%s181_s22] sm:$0x3] %v428_v28 }
 0x109 PF: > { %s14_s12 = sadd.s32 1, %s640_s12  }
 0x10a   : > { %p11_p4 = scmp.ge.s32.totalorder %s14_s12, 4  }
 0x10c   :  { %13 = sbr.rel (!%p11_p4) target bundleno = 1 (0x1), region = 70 }

// kernel: double_conv.5
= control target key start
LH: loop header
LB: loop body
LE: loop exit
PB: predicated region body
PF: predicated region fallthrough
CT: control target
= control target key end

     0   :  { %8 = vsyncpa [#allocation3], 0  ;;  %s534_s0 = inlined_call_operand.vmem [shape: f32[2,16,128], index: 0, kind: input, shape index: {}]   ;;  %s535_s1 = inlined_call_operand.vmem [shape: f32[1,128], index: 1, kind: input, shape index: {}]   ;;  %s536_s2 = inlined_call_operand.vmem [shape: f32[1,128], index: 2, kind: input, shape index: {}]   ;;  %s537_s3 = inlined_call_operand.hbm [shape: f32[2,8,16], index: 3, kind: output, shape index: {}]  }
   0x1   :  { %10 = vsyncpa [#allocation3 + $0x1], 0  ;;  %s435_s12 = smov 0   ;;  %s437_s13 = smov 0  }
   0x2   :  { %s439_s14 = smov 0   ;;  %s441_s15 = smov 0  }
   0x3 LB: > { %s456_s16 = sadd.s32 4294967295, %s412_s15   ;;  %s298_s17 = sadd.s32 4294967294, %s412_s15   ;;  %s412_s15 = sphi %s441_s15, %s543_s15   ;;  %s408_s14 = sphi %s439_s14, %s542_s14   ;;  %s404_s13 = sphi %s437_s13, %s541_s13   ;;  %s400_s12 = sphi %s435_s12, %s540_s12  }
   0x4   : > { %s460_s18 = sadd.s32 1, %s412_s15   ;;  %s91_s19 = sadd.s32 1, %s408_s14 }
   0x5   : > { %s88_s20 = ssub.s32 %s412_s15, %s460_s18  ;;  %p101_p0 = scmp.ne.s32.totalorder %s408_s14, %s404_s13 }
   0x6   : > { %p89_p1 = scmp.eq.s32.totalorder %s88_s20, 0  ;;  %p102_p2 = scmp.eq.s32.totalorder %s456_s16, 1 }
   0x7   : > { %p107_p3 = scmp.ne.s32.totalorder %s404_s13, %s400_s12  ;;  %p108_p4 = scmp.eq.s32.totalorder %s298_s17, 1 }
   0x8   : > { %s471_s21 = scalar_select %p89_p1, %s408_s14, %s91_s19  }
   0x9   : > { %p473_p5 = por %p102_p2, %p101_p0  ;;  %p477_p6 = por %p108_p4, %p107_p3 }
   0xa   : > { %p301_p7 = scmp.ge.s32.totalorder %s412_s15, 1  ;;  %p140_p8 = scmp.lt.s32.totalorder %s412_s15, 3 }
   0xc   : > { %p141_p9 = pnand %p301_p7, %p140_p8 }
   0xd   : > { %p164_p10 = scmp.lt.s32.totalorder (!%p141_p9), %s456_s16, 1  ;;  %s161_s6 = sand.u32 (!%p141_p9), 1, %s404_s13  }
   0xe   : > { %144 = sbr.rel (%p141_p9) target bundleno = 168 (0xa8), region = 32  ;;  %s302_s7 = sshll.u32 (!%p141_p9), %s161_s6, 3 }
   0xf   : > { %s308_s8 = sshll.u32 (!%p141_p9), %s456_s16, 7  ;;  %s163_s9 = scalar_lea.vmem (!%p141_p9), [#allocation2], %s302_s7 }
  0x10   : > { %s239_s10 = sshll.u32 (!%p141_p9), %s163_s9, 4  ;;  %s499_s19 = scalar_lea.hbm (!%p141_p9), %s537_s3, %s308_s8  ;;  %s240_s10 = int_to_ptr.vmem [resolvable:$true] %s239_s10 }
  0x11   : > { %s226_s20 = scalar_lea.sflag (!%p141_p9), [#allocation3], %s161_s6 }
  0x13   : > { %s165_s24 = scalar_select %p164_p10, %s456_s16, 1  ;;  %v305_v0 = vld [vmem:[%s535_s1] ss:$0 sm:$0xff]  ;;  %vm223_vm0 = vcmask 130048  }
  0x14   : > { %v306_v2 = vld [vmem:[%s536_s2] ss:$0 sm:$0xff] }
  0x15   : > { %s311_s25 = sshll.u32 %s165_s24, 4  ;;  %s352_s24 = scalar_lea.vmem %s240_s10, 128 }
  0x16   : > { %s168_s30 = scalar_lea.vmem %s534_s0, %s311_s25  ;;  %p353_p11 = scmp.ne.s32.totalorder %s240_s10, %s352_s24 }
  0x17   : > { %v169_v1 = vld [vmem:[%s168_s30] sm:$0xff]  ;;  %v170_v3 = vld [vmem:[%s168_s30 + $0x8] sm:$0xff]  ;;  %s414_s25 = smov [#allocation2]  }
  0x18   : > { %v178_v4 = vmul.f32 %v305_v0, %v169_v1  ;;  %v179_v5 = vmul.f32 %v305_v0, %v170_v3  ;;  %p354_p12 = pnand %p353_p11, %p473_p5  ;;  %s356_s26 = sshll.u32 %s414_s25, 4  ;;  %s357_s26 = int_to_ptr.vmem [resolvable:$false] %s356_s26 }
  0x19   : > { %s358_s16 = scalar_lea.vmem %s357_s26, 256  ;;  %p359_p0 = scmp.lt.s32.totalorder %s240_s10, %s357_s26 }
  0x1a   : > { %v187_v6 = vadd.f32 %v306_v2, %v178_v4  ;;  %v188_v7 = vadd.f32 %v306_v2, %v179_v5  ;;  %p355_p13 = pneg %p354_p12  ;;  %p360_p1 = scmp.lt.s32.totalorder %s358_s16, %s352_s24 }
  0x1c   : > { %v189_v8 = vmax.f32 %v187_v6, 0.0  ;;  %v190_v9 = vmax.f32 %v188_v7, 0.0  ;;  %p361_p2 = por %p360_p1, %p359_p0 }
  0x1e   : > { %191 = vxpose.xlu0.b32.start [1/2] (short) (narrow) %v189_v8, 8  ;;  %p362_p3 = pnand %p361_p2, %p355_p13 }
  0x22   : > { %192 = vxpose.xlu0.b32.end [2/2] (short) (narrow) %v190_v9, 8 }
  0x9a   : > { %v207_v10 = vpop.trf.xlu0 }
  0x9b   : > { %224 = vst.msk [vmem:[%s163_s9] sm:$0xff] %vm223_vm0, %v207_v10 }
  0x9c   : > { %365 = shalt.err (!%p362_p3)
}
  0x9d   : > { %s366_s27 = scalar_lea.hbm %s499_s19, 128  ;;  %s370_s30 = scalar_lea.hbm %s537_s3, 256 }
  0x9e   : > { %p367_p4 = scmp.ne.s32.totalorder %s499_s19, %s366_s27  ;;  %p371_p9 = scmp.lt.s32.totalorder %s499_s19, %s537_s3 }
  0x9f   : > { %p372_p10 = scmp.lt.s32.totalorder %s370_s30, %s366_s27 }
  0xa0   : > { %p368_p7 = pnand %p367_p4, %p473_p5 }
  0xa1   : > { %p373_p11 = por %p372_p10, %p371_p9 }
  0xa2   : > { %p369_p8 = pneg %p368_p7 }
  0xa4   : > { %p374_p12 = pnand %p373_p11, %p369_p8 }
  0xa6   : > { %377 = shalt.err (!%p374_p12)
}
  0xa7   : > { %312 = dma.vmem_to_hbm [thread:$0]  (%p473_p5), %s240_s10, 128, %s499_s19, %s226_s20  }
  0xa8 PF: > { %p318_p13 = scmp.ge.s32.totalorder %s412_s15, 2  ;;  %s251_s6 = sand.u32 1, %s400_s12  }
  0xa9   : > { %s252_s7 = scalar_lea.sflag [#allocation3], %s251_s6 }
  0xaa   : > { %p315_p0 = pnand %p318_p13, %p477_p6 }
  0xac   : > { %p316_p1 = pneg %p315_p0 }
  0xae   : > { %395 = dma.done.wait (%p316_p1), %s252_s7, 128  }
  0xaf   : > { %397 = vsyncadd (%p316_p1), %s252_s7, 4294967168  ;;  %p13_p2 = scmp.ge.s32.totalorder %s460_s18, 4   ;;  %s540_s12 = smov %s404_s13 }
  0xb0   : > { %s541_s13 = smov %s408_s14  ;;  %s542_s14 = smov %s471_s21 }
  0xb1   : > { %s543_s15 = smov %s460_s18  ;;  %15 = sbr.rel (!%p13_p2) target bundleno = 3 (0x3), region = 67 }
  0xb6   :  { %257 = vsyncpa [#allocation3], 1 }
  0xb7   :  { %259 = vsyncpa [#allocation3 + $0x1], 1 }

// kernel: double_conv.4
= control target key start
LH: loop header
LB: loop body
LE: loop exit
PB: predicated region body
PF: predicated region fallthrough
CT: control target
= control target key end

     0   :  { %s749_s18 = smov 0   ;;  %s949_s0 = inlined_call_operand.vmem [shape: f32[2,16,128], index: 0, kind: input, shape index: {}]   ;;  %s950_s1 = inlined_call_operand.vmem [shape: f32[1,128], index: 1, kind: input, shape index: {}]   ;;  %s951_s2 = inlined_call_operand.vmem [shape: f32[1,128], index: 2, kind: input, shape index: {}]   ;;  %s952_s3 = inlined_call_operand.vmem [shape: f32[384,128], index: 3, kind: input, shape index: {}]   ;;  %s953_s4 = inlined_call_operand.vmem [shape: f32[2,16,128], index: 4, kind: output, shape index: {0}]   ;;  %s954_s5 = inlined_call_operand.vmem [shape: f32[2,2,128], index: 5, kind: output, shape index: {1}]  }
   0x1 LB: > { %s592_s19 = sadd.s32 4294967295, %s716_s18   ;;  %p596_p0 = scmp.ge.s32.totalorder %s716_s18, 1  ;;  %s716_s18 = sphi %s749_s18, %s16_s18  }
   0x2   : > { %p190_p1 = scmp.lt.s32.totalorder %s716_s18, 3 }
   0x4   : > { %p191_p2 = pnand %p596_p0, %p190_p1 }
   0x5   : > { %p772_p3 = scmp.lt.s32.totalorder (!%p191_p2), %s592_s19, 1 }
   0x6   : > { %194 = sbr.rel (%p191_p2) target bundleno = 265 (0x109), region = 36 }
   0xb   : > { %v318_v0 = vld [vmem:[%s952_s3 + $0xf8] sm:$0xff]  ;;  %v317_v2 = vld [vmem:[%s952_s3 + $0xf0] sm:$0xff]  ;;  %v316_v5 = vld [vmem:[%s952_s3 + $0xe8] sm:$0xff]  ;;  %s957_s19 = smov (!%p772_p3, %s592_s19), 1  ;;  %v258_v24 = vlaneseq  ;;  %v718_v60 = vmov 0.0   ;;  %vm501_vm4 = vcmask 1040384  }
   0xc   : > { %v302_v1 = vld [vmem:[%s952_s3 + $0x78] sm:$0xff]  ;;  %610 = vmatprep.subr.mxu0 %v318_v0  ;;  %v301_v4 = vld [vmem:[%s952_s3 + $0x70] sm:$0xff]  ;;  %v300_v7 = vld [vmem:[%s952_s3 + $0x68] sm:$0xff]  ;;  %s608_s9 = sshll.u32 %s957_s19, 4 }
   0xd   : > { %v334_v3 = vld [vmem:[%s952_s3 + $0x178] sm:$0xff]  ;;  %611 = vmatpush3.msra.mxu0 %v302_v1  ;;  %v333_v6 = vld [vmem:[%s952_s3 + $0x170] sm:$0xff]  ;;  %v332_v8 = vld [vmem:[%s952_s3 + $0x168] sm:$0xff]  ;;  %s226_s22 = scalar_lea.vmem %s949_s0, %s608_s9  ;;  %v867_v37 = vshrl.u32 %v258_v24, 7  ;;  %s231_s13 = scalar_lea.vmem %s953_s4, %s608_s9 }
   0xe   : > { %666 = vmatprep.subr.mxu1 %v334_v3  ;;  %612 = vmatprep.subr.mxu0 %v317_v2  ;;  %v315_v9 = vld [vmem:[%s952_s3 + $0xe0] sm:$0xff]  ;;  %v314_v12 = vld [vmem:[%s952_s3 + $0xd8] sm:$0xff]  ;;  %v313_v15 = vld [vmem:[%s952_s3 + $0xd0] sm:$0xff]  ;;  %s601_s9 = sshll.u32 %s957_s19, 1 }
   0xf   : > { %667 = vmatpush3.msra.mxu1 %v334_v3  ;;  %613 = vmatpush3.msra.mxu0 %v301_v4  ;;  %v299_v10 = vld [vmem:[%s952_s3 + $0x60] sm:$0xff]  ;;  %v298_v13 = vld [vmem:[%s952_s3 + $0x58] sm:$0xff]  ;;  %v297_v16 = vld [vmem:[%s952_s3 + $0x50] sm:$0xff]  ;;  %v260_v48 = vadd.s32 8, %v867_v37  ;;  %vm261_vm0 = vcmp.gt.s32.totalorder %v867_v37, 0  ;;  %vm275_vm1 = vcmp.lt.s32.totalorder %v867_v37, 1  ;;  %s235_s16 = scalar_lea.vmem %s954_s5, %s601_s9 }
  0x10   : > { %668 = vmatprep.subr.mxu1 %v333_v6  ;;  %614 = vmatprep.subr.mxu0 %v316_v5  ;;  %v331_v11 = vld [vmem:[%s952_s3 + $0x160] sm:$0xff]  ;;  %v330_v14 = vld [vmem:[%s952_s3 + $0x158] sm:$0xff]  ;;  %v329_v17 = vld [vmem:[%s952_s3 + $0x150] sm:$0xff]  ;;  %vm282_vm2 = vcmp.lt.s32.totalorder %v867_v37, 7  ;;  %v604_v61 = vsel %vm261_vm0, 1.0, %v718_v60 }
  0x11   : > { %669 = vmatpush3.msra.mxu1 %v333_v6  ;;  %615 = vmatpush3.msra.mxu0 %v300_v7  ;;  %v312_v18 = vld [vmem:[%s952_s3 + $0xc8] sm:$0xff]  ;;  %v311_v21 = vld [vmem:[%s952_s3 + $0xc0] sm:$0xff]  ;;  %v310_v25 = vld [vmem:[%s952_s3 + $0xb8] sm:$0xff]  ;;  %vm268_vm3 = vcmp.lt.s32.totalorder %v260_v48, 15 }
  0x12   : > { %670 = vmatprep.subr.mxu1 %v332_v8  ;;  %616 = vmatprep.subr.mxu0 %v315_v9  ;;  %v296_v19 = vld [vmem:[%s952_s3 + $0x48] sm:$0xff]  ;;  %v295_v22 = vld [vmem:[%s952_s3 + $0x40] sm:$0xff]  ;;  %v294_v26 = vld [vmem:[%s952_s3 + $0x38] sm:$0xff]  ;;  %v605_v3 = vsel %vm268_vm3, 1.0, %v718_v60 }
  0x13   : > { %671 = vmatpush3.msra.mxu1 %v332_v8  ;;  %617 = vmatpush3.msra.mxu0 %v299_v10  ;;  %v328_v20 = vld [vmem:[%s952_s3 + $0x148] sm:$0xff]  ;;  %v327_v23 = vld [vmem:[%s952_s3 + $0x140] sm:$0xff]  ;;  %v309_v27 = vld [vmem:[%s952_s3 + $0xb0] sm:$0xff] }
  0x14   : > { %672 = vmatprep.subr.mxu1 %v331_v11  ;;  %618 = vmatprep.subr.mxu0 %v314_v12  ;;  %v326_v28 = vld [vmem:[%s952_s3 + $0x138] sm:$0xff]  ;;  %v236_v29 = vld [vmem:[%s226_s22] sm:$0xff]  ;;  %v237_v30 = vld [vmem:[%s226_s22 + $0x8] sm:$0xff] }
  0x15   : > { %673 = vmatpush3.msra.mxu1 %v331_v11  ;;  %619 = vmatpush3.msra.mxu0 %v298_v13  ;;  %v602_v31 = vld [vmem:[%s950_s1] ss:$0 sm:$0xff]  ;;  %v293_v33 = vld [vmem:[%s952_s3 + $0x30] sm:$0xff]  ;;  %v308_v38 = vld [vmem:[%s952_s3 + $0xa8] sm:$0xff] }
  0x16   : > { %674 = vmatprep.subr.mxu1 %v330_v14  ;;  %620 = vmatprep.subr.mxu0 %v313_v15  ;;  %v603_v32 = vld [vmem:[%s951_s2] ss:$0 sm:$0xff]  ;;  %v325_v34 = vld [vmem:[%s952_s3 + $0x130] sm:$0xff]  ;;  %v245_v35 = vmul.f32 %v602_v31, %v236_v29  ;;  %v246_v36 = vmul.f32 %v602_v31, %v237_v30  ;;  %v292_v39 = vld [vmem:[%s952_s3 + $0x28] sm:$0xff] }
  0x17   : > { %675 = vmatpush3.msra.mxu1 %v330_v14  ;;  %621 = vmatpush3.msra.mxu0 %v297_v16  ;;  %v324_v40 = vld [vmem:[%s952_s3 + $0x128] sm:$0xff]  ;;  %v307_v43 = vld [vmem:[%s952_s3 + $0xa0] sm:$0xff]  ;;  %v306_v49 = vld [vmem:[%s952_s3 + $0x98] sm:$0xff] }
  0x18   : > { %676 = vmatprep.subr.mxu1 %v329_v17  ;;  %622 = vmatprep.subr.mxu0 %v312_v18  ;;  %v254_v41 = vadd.f32 %v603_v32, %v245_v35  ;;  %v255_v42 = vadd.f32 %v603_v32, %v246_v36  ;;  %v291_v44 = vld [vmem:[%s952_s3 + $0x20] sm:$0xff]  ;;  %v290_v50 = vld [vmem:[%s952_s3 + $0x18] sm:$0xff]  ;;  %v305_v54 = vld [vmem:[%s952_s3 + $0x90] sm:$0xff] }
  0x19   : > { %677 = vmatpush3.msra.mxu1 %v329_v17  ;;  %623 = vmatpush3.msra.mxu0 %v296_v19  ;;  %v323_v45 = vld [vmem:[%s952_s3 + $0x120] sm:$0xff]  ;;  %v322_v51 = vld [vmem:[%s952_s3 + $0x118] sm:$0xff]  ;;  %v289_v57 = vld [vmem:[%s952_s3 + $0x10] sm:$0xff] }
  0x1a   : > { %678 = vmatprep.subr.mxu1 %v328_v20  ;;  %624 = vmatprep.subr.mxu0 %v311_v21  ;;  %v256_v46 = vmax.f32 %v254_v41, 0.0  ;;  %v257_v47 = vmax.f32 %v255_v42, 0.0  ;;  %v321_v58 = vld [vmem:[%s952_s3 + $0x110] sm:$0xff]  ;;  %v304_v59 = vld [vmem:[%s952_s3 + $0x88] sm:$0xff]  ;;  %v303_v1 = vld [vmem:[%s952_s3 + $0x80] sm:$0xff] }
  0x1b   : > { %679 = vmatpush3.msra.mxu1 %v328_v20  ;;  %625 = vmatpush3.msra.mxu0 %v295_v22  ;;  %v288_v63 = vld [vmem:[%s952_s3 + $0x8] sm:$0xff]  ;;  %v287_v4 = vld [vmem:[%s952_s3] sm:$0xff] }
  0x1c   : > { %680 = vmatprep.subr.mxu1 %v327_v23  ;;  %626 = vmatprep.subr.mxu0 %v310_v25  ;;  %v273_v52 = vrot.slane %v256_v46, 7  ;;  %v274_v53 = vrot.slane %v257_v47, 7  ;;  %v280_v55 = vrot.slane %v256_v46, 1  ;;  %v281_v56 = vrot.slane %v257_v47, 1  ;;  %v320_v0 = vld [vmem:[%s952_s3 + $0x108] sm:$0xff]  ;;  %v319_v6 = vld [vmem:[%s952_s3 + $0x100] sm:$0xff] }
  0x1d   : > { %681 = vmatpush3.msra.mxu1 %v327_v23  ;;  %627 = vmatpush3.msra.mxu0 %v294_v26 }
  0x1e   : > { %682 = vmatprep.subr.mxu1 %v326_v28  ;;  %628 = vmatprep.subr.mxu0 %v309_v27  ;;  %v277_v62 = vsel %vm275_vm1, %v274_v53, %v273_v52  ;;  %v284_v2 = vsel %vm282_vm2, %v281_v56, %v280_v55  ;;  %v283_v7 = vsel %vm282_vm2, %v280_v55, %v281_v56 }
  0x1f   : > { %683 = vmatpush3.msra.mxu1 %v326_v28  ;;  %629 = vmatpush3.msra.mxu0 %v293_v33  ;;  %v278_v5 = vmul.f32 %v604_v61, %v277_v62  ;;  %v286_v8 = vmul.f32 %v605_v3, %v284_v2  ;;  %v276_v9 = vsel %vm275_vm1, %v273_v52, %v274_v53 }
  0x20   : > { %684 = vmatprep.subr.mxu1 %v325_v34  ;;  %630 = vmatprep.subr.mxu0 %v308_v38 }
  0x21   : > { %685 = vmatpush3.msra.mxu1 %v325_v34  ;;  %631 = vmatpush3.msra.mxu0 %v292_v39 }
  0x22   : > { %686 = vmatprep.subr.mxu1 %v324_v40  ;;  %632 = vmatprep.subr.mxu0 %v307_v43 }
  0x23   : > { %687 = vmatpush3.msra.mxu1 %v324_v40  ;;  %633 = vmatpush3.msra.mxu0 %v291_v44 }
  0x24   : > { %688 = vmatprep.subr.mxu1 %v323_v45  ;;  %634 = vmatprep.subr.mxu0 %v306_v49 }
  0x25   : > { %689 = vmatpush3.msra.mxu1 %v323_v45  ;;  %635 = vmatpush3.msra.mxu0 %v290_v50 }
  0x26   : > { %690 = vmatprep.subr.mxu1 %v322_v51  ;;  %636 = vmatprep.subr.mxu0 %v305_v54 }
  0x27   : > { %691 = vmatpush3.msra.mxu1 %v322_v51  ;;  %637 = vmatpush3.msra.mxu0 %v289_v57 }
  0x28   : > { %692 = vmatprep.subr.mxu1 %v321_v58  ;;  %638 = vmatprep.subr.mxu0 %v304_v59 }
  0x29   : > { %693 = vmatpush3.msra.mxu1 %v321_v58  ;;  %639 = vmatpush3.msra.mxu0 %v288_v63 }
  0x2a   : > { %694 = vmatprep.subr.mxu1 %v320_v0  ;;  %640 = vmatprep.subr.mxu0 %v303_v1 }
  0x2b   : > { %399 = vmatprep.mubr.f32.mxu0 %v256_v46  ;;  %641 = vmatpush3.msra.mxu0 %v287_v4 }
  0x2c   : > { %695 = vmatpush3.msra.mxu1 %v320_v0  ;;  %400 = vmatmul.mubr.f32.vlgmr.msra.gmra.mxu0 %v278_v5 }
  0x2d   : > { %696 = vmatprep.subr.mxu1 %v319_v6  ;;  %698 = vmatprep.mubr.f32.mxu1 %v283_v7 }
  0x2e   : > { %697 = vmatpush3.msra.mxu1 %v319_v6  ;;  %404 = vmatprep.mubr.f32.mxu0 %v257_v47 }
  0x2f   : > { %699 = vmatmul.mubr.f32.vlgmr.msra.gmra.mxu1 %v286_v8 }
  0x30   : > { %405 = vmatmul.mubr.f32.gmra.mxu0 %v276_v9 }
  0xec   : > { %v642_v10 = vpop.f32.mrf.mxu0 }
  0xee   : > { %v643_v11 = vpop.f32.mrf.mxu0 }
  0xef   : > { %v700_v12 = vpop.f32.mrf.mxu1  ;;  %v644_v13 = vadd.f32 %v643_v11, %v642_v10 }
  0xf0   : > { %v645_v14 = vpop.f32.mrf.mxu0 }
  0xf1   : > { %v476_v15 = vpop.f32.mrf.mxu1 }
  0xf2   : > { %v477_v16 = vadd.f32 %v644_v13, %v476_v15  ;;  %v646_v17 = vpop.f32.mrf.mxu0 }
  0xf3   : > { %v647_v18 = vadd.f32 %v646_v17, %v645_v14 }
  0xf4   : > { %504 = vst [vmem:[%s231_s13] sm:$0xff] %v477_v16  ;;  %v492_v20 = vmul.f32 %v477_v16, %v477_v16 }
  0xf5   : > { %v482_v19 = vadd.f32 %v700_v12, %v647_v18 }
  0xf7   : > { %v485_v21 = vadd.f32 %v482_v19, %v477_v16  ;;  %v493_v22 = vmul.f32 %v482_v19, %v482_v19  ;;  %505 = vst [vmem:[%s231_s13 + $0x8] sm:$0xff] %v482_v19 }
  0xf9   : > { %v486_v23 = vrot.slane %v485_v21, 4  ;;  %v494_v24 = vadd.f32 %v493_v22, %v492_v20 }
  0xfb   : > { %v487_v25 = vadd.f32 %v486_v23, %v485_v21  ;;  %v495_v26 = vrot.slane %v494_v24, 4 }
  0xfd   : > { %v488_v27 = vrot.slane %v487_v25, 2  ;;  %v496_v28 = vadd.f32 %v495_v26, %v494_v24 }
  0xff   : > { %v489_v29 = vadd.f32 %v488_v27, %v487_v25  ;;  %v497_v30 = vrot.slane %v496_v28, 2 }
 0x101   : > { %v490_v31 = vrot.slane %v489_v29, 1  ;;  %v498_v32 = vadd.f32 %v497_v30, %v496_v28 }
 0x103   : > { %v499_v33 = vrot.slane %v498_v32, 1  ;;  %v491_v34 = vadd.f32 %v490_v31, %v489_v29 }
 0x105   : > { %v500_v35 = vadd.f32 %v499_v33, %v498_v32 }
 0x107   : > { %v502_v36 = vsel %vm501_vm4, %v491_v34, %v500_v35 }
 0x108   : > { %503 = vst [vmem:[%s235_s16] sm:$0x3] %v502_v36 }
 0x109 PF: > { %s16_s18 = sadd.s32 1, %s716_s18  }
 0x10a   : > { %p13_p4 = scmp.ge.s32.totalorder %s16_s18, 4  }
 0x10c   :  { %15 = sbr.rel (!%p13_p4) target bundleno = 1 (0x1), region = 78 }

</bundles_post_ra>
